<compile_context>
chip_gen: v7x
topology: tpu7x:2x2x1
jax: 0.10.0
libtpu: 0.0.40
codegen_flags: <defaults>
</compile_context>

<pallas_src>
import functools

import jax
import jax.numpy as jnp
import numpy as np
from jax.experimental import pallas as pl
from jax.experimental.pallas import tpu as pltpu


def _pool_kernel(x_ref, c_ref, o_ref, *, h, w, half):
    """One block = `nt` whole flattened (h*w) planes stacked along sublanes.

    x_ref / o_ref : (nt, h*w)        input / output planes
    c_ref         : (4*half+1, h*w)  0/1 shift-validity masks + 1/divisor,
                                     resident in VMEM (constant index_map)
    """
    hw = h * w
    x = x_ref[...].astype(jnp.float32)

    def mask(row):
        return c_ref[row:row + 1, :]          # (1, hw), broadcasts over planes

    # ---- window sum along W: lane rolls by +-s --------------------------------
    # Masks zero the image borders and stop the roll from leaking across
    # image-row boundaries inside the flattened plane.
    sw = x
    for s in range(1, half + 1):
        if s >= w:
            break
        sw = sw + pltpu.roll(x, s, axis=1) * mask(s - 1)                  # left
        sw = sw + pltpu.roll(x, hw - s, axis=1) * mask(half + s - 1)      # right

    # ---- window sum along H: lane rolls by +-s*W -------------------------------
    tot = sw
    for s in range(1, half + 1):
        if s >= h:
            break
        tot = tot + pltpu.roll(sw, s * w, axis=1) * mask(2 * half + s - 1)      # up
        tot = tot + pltpu.roll(sw, hw - s * w, axis=1) * mask(3 * half + s - 1)  # down

    inv = c_ref[4 * half:4 * half + 1, :]     # 1 / count_include_pad=False divisor
    o_ref[...] = (tot * inv - x).astype(o_ref.dtype)


def _rows_per_block(n_planes, plane_f32_bytes, target_bytes):
    """Planes folded into one grid step (sublane dim of the block)."""
    if n_planes <= 8:
        return n_planes                       # block dim == full array dim (allowed)
    cap = max(8, (max(1, target_bytes // plane_f32_bytes) // 8) * 8)
    # keep >= 2 grid steps so both v7x TensorCores get work
    cap = min(cap, max(8, 8 * ((n_planes - 1) // 8)))
    # prefer a block size that divides n_planes exactly (no partial trailing block)
    for nt in range(cap, 7, -8):
        if n_planes % nt == 0:
            return nt
    return cap


def pooling_forward(x, pool_size=3, *, target_block_bytes=2 << 20):
    """Pooling.forward: AvgPool2d(k, stride=1, pad=k//2, count_include_pad=False)(x) - x."""
    if pool_size % 2 != 1:
        # TODO(synk): even pool_size needs asymmetric padding and a shifted output
        # grid; the module's default (3) and any odd size are supported.
        raise ValueError("only odd pool_size is supported")

    b, c, h, w = x.shape
    half = pool_size // 2
    hw = h * w
    n_planes = b * c

    nt = _rows_per_block(n_planes, hw * 4, target_block_bytes)
    num_blocks = -(-n_planes // nt)

    x2d = x.reshape(n_planes, hw)             # free reshape of contiguous NCHW

    # Constant planes: 0/1 validity masks for every shift + reciprocal of the
    # count_include_pad=False divisor.  Shape (4*half+1, hw), f32, resident.
    jj = np.tile(np.arange(w), h)             # column within image row
    ii = np.repeat(np.arange(h), w)           # image row
    rows = []
    for s in range(1, half + 1):
        rows.append(jj >= s)                  # left neighbour valid
    for s in range(1, half + 1):
        rows.append(jj < w - s)               # right neighbour valid
    for s in range(1, half + 1):
        rows.append(ii >= s)                  # up neighbour valid
    for s in range(1, half + 1):
        rows.append(ii < h - s)               # down neighbour valid
    cnt_w = np.minimum(jj + half, w - 1) - np.maximum(jj - half, 0) + 1
    cnt_h = np.minimum(ii + half, h - 1) - np.maximum(ii - half, 0) + 1
    rows.append(1.0 / (cnt_h * cnt_w))
    consts = jnp.asarray(np.stack(rows).astype(np.float32))   # (4*half+1, hw)

    # VMEM budget: double-buffered in/out blocks (stored dtype), ~8x an f32
    # block of in-kernel temporaries, plus the tiny resident constants.
    # TODO(synk): single planes with H*W*4 >~ 6 MiB would additionally need
    # tiling along the H*W axis; not needed for PoolFormer stage shapes.
    itemsize = x.dtype.itemsize
    io_bytes = nt * hw * itemsize
    f32_bytes = nt * hw * 4
    vmem_limit = int(min(48 << 20,
                         max(16 << 20,
                             4 * io_bytes + 8 * f32_bytes
                             + 2 * consts.size * 4 + (2 << 20))))

    n_elems = n_planes * hw
    cost = pl.CostEstimate(
        flops=int((8 * half + 3) * n_elems),
        transcendentals=0,
        bytes_accessed=int(2 * n_elems * itemsize + consts.size * 4),
    )

    kernel = functools.partial(_pool_kernel, h=h, w=w, half=half)

    out2d = pl.pallas_call(
        kernel,
        out_shape=jax.ShapeDtypeStruct((n_planes, hw), x.dtype),
        grid_spec=pltpu.PrefetchScalarGridSpec(
            num_scalar_prefetch=0,
            grid=(num_blocks,),
            in_specs=[
                pl.BlockSpec((nt, hw), lambda g: (g, 0)),
                pl.BlockSpec((4 * half + 1, hw), lambda g: (0, 0)),  # resident consts
            ],
            out_specs=pl.BlockSpec((nt, hw), lambda g: (g, 0)),
        ),
        compiler_params=pltpu.CompilerParams(
            dimension_semantics=("parallel",),
            vmem_limit_bytes=vmem_limit,
        ),
        cost_estimate=cost,
    )(x2d, consts)

    return out2d.reshape(b, c, h, w)


def pooling_reference(x, pool_size=3):
    """Plain-JAX reference mirroring nn.AvgPool2d(..., count_include_pad=False)(x) - x."""
    half = pool_size // 2
    b, c, h, w = x.shape
    xp = jnp.pad(x, ((0, 0), (0, 0), (half, half), (half, half)))
    op = jnp.pad(jnp.ones((1, 1, h, w), x.dtype),
                 ((0, 0), (0, 0), (half, half), (half, half)))
    s = jnp.zeros_like(x)
    cnt = jnp.zeros((1, 1, h, w), x.dtype)
    for di in range(pool_size):
        for dj in range(pool_size):
            s = s + xp[:, :, di:di + h, dj:dj + w]
            cnt = cnt + op[:, :, di:di + h, dj:dj + w]
    return s / cnt - x


if __name__ == "__main__":
    key = jax.random.PRNGKey(0)
    B, C, H, W = 2, 4, 16, 16
    x = jax.random.normal(key, (B, C, H, W), dtype=jnp.float32)

    out = pooling_forward(x, pool_size=3)
    out = jax.block_until_ready(out)

    ref = pooling_reference(x, pool_size=3)
    np.testing.assert_allclose(np.asarray(out), np.asarray(ref),
                               rtol=1e-5, atol=1e-5)

    print("KERNEL_OK")
</pallas_src>

<mosaic_0001>
module attributes {stable_mosaic.version = 11 : i64} {
  func.func @_pool_kernel(%arg0: i32, %arg1: memref<8x256xf32, #tpu.memory_space<vmem>>, %arg2: memref<5x256xf32, #tpu.memory_space<vmem>>, %arg3: memref<8x256xf32, #tpu.memory_space<vmem>>) attributes {dimension_semantics = [#tpu.dimension_semantics<parallel>], iteration_bounds = array<i64: 1>, scalar_prefetch = 0 : i64, scratch_operands = 0 : i64, tpu.core_type = #tpu.core_type<tc>, window_params = [{transform_indices = @transform_0, window_bounds = array<i64: 8, 256>}, {pipeline_mode = #tpu.pipeline_mode<synchronous>, transform_indices = @transform_1, window_bounds = array<i64: 5, 256>}, {transform_indices = @transform_2, window_bounds = array<i64: 8, 256>}]} {
    %c0 = arith.constant 0 : index
    %c0_0 = arith.constant 0 : index
    %0 = vector.load %arg1[%c0, %c0_0] : memref<8x256xf32, #tpu.memory_space<vmem>>, vector<8x256xf32>
    %c1_i32 = arith.constant 1 : i32
    %1 = tpu.dynamic_rotate %0 by %c1_i32 dim 1 : vector<8x256xf32>, i32 -> vector<8x256xf32>
    %c0_1 = arith.constant 0 : index
    %c0_2 = arith.constant 0 : index
    %2 = vector.load %arg2[%c0_1, %c0_2] : memref<5x256xf32, #tpu.memory_space<vmem>>, vector<1x256xf32>
    %3 = vector.broadcast %2 : vector<1x256xf32> to vector<8x256xf32>
    %4 = arith.mulf %1, %3 : vector<8x256xf32>
    %5 = arith.addf %0, %4 : vector<8x256xf32>
    %c255_i32 = arith.constant 255 : i32
    %6 = tpu.dynamic_rotate %0 by %c255_i32 dim 1 : vector<8x256xf32>, i32 -> vector<8x256xf32>
    %c1 = arith.constant 1 : index
    %c0_3 = arith.constant 0 : index
    %7 = vector.load %arg2[%c1, %c0_3] : memref<5x256xf32, #tpu.memory_space<vmem>>, vector<1x256xf32>
    %8 = vector.broadcast %7 : vector<1x256xf32> to vector<8x256xf32>
    %9 = arith.mulf %6, %8 : vector<8x256xf32>
    %10 = arith.addf %5, %9 : vector<8x256xf32>
    %c16_i32 = arith.constant 16 : i32
    %11 = tpu.dynamic_rotate %10 by %c16_i32 dim 1 : vector<8x256xf32>, i32 -> vector<8x256xf32>
    %c2 = arith.constant 2 : index
    %c0_4 = arith.constant 0 : index
    %12 = vector.load %arg2[%c2, %c0_4] : memref<5x256xf32, #tpu.memory_space<vmem>>, vector<1x256xf32>
    %13 = vector.broadcast %12 : vector<1x256xf32> to vector<8x256xf32>
    %14 = arith.mulf %11, %13 : vector<8x256xf32>
    %15 = arith.addf %10, %14 : vector<8x256xf32>
    %c240_i32 = arith.constant 240 : i32
    %16 = tpu.dynamic_rotate %10 by %c240_i32 dim 1 : vector<8x256xf32>, i32 -> vector<8x256xf32>
    %c3 = arith.constant 3 : index
    %c0_5 = arith.constant 0 : index
    %17 = vector.load %arg2[%c3, %c0_5] : memref<5x256xf32, #tpu.memory_space<vmem>>, vector<1x256xf32>
    %18 = vector.broadcast %17 : vector<1x256xf32> to vector<8x256xf32>
    %19 = arith.mulf %16, %18 : vector<8x256xf32>
    %20 = arith.addf %15, %19 : vector<8x256xf32>
    %c4 = arith.constant 4 : index
    %c0_6 = arith.constant 0 : index
    %21 = vector.load %arg2[%c4, %c0_6] : memref<5x256xf32, #tpu.memory_space<vmem>>, vector<1x256xf32>
    %22 = vector.broadcast %21 : vector<1x256xf32> to vector<8x256xf32>
    %23 = arith.mulf %20, %22 : vector<8x256xf32>
    %24 = arith.subf %23, %0 : vector<8x256xf32>
    %c0_7 = arith.constant 0 : index
    %c0_8 = arith.constant 0 : index
    %25 = vector.load %arg3[%c0_7, %c0_8] : memref<8x256xf32, #tpu.memory_space<vmem>>, vector<8x256xf32>
    tpu.vector_store %arg3[%c0_7, %c0_8], %24 {strides = array<i32>} : memref<8x256xf32, #tpu.memory_space<vmem>>, vector<8x256xf32>,
    return
  }
  func.func @transform_0(%arg0: i32) -> (i32, i32) {
    %c0_i32 = arith.constant 0 : i32
    %c0_i32_0 = arith.constant 0 : i32
    return %arg0, %c0_i32 : i32, i32
  }
  func.func @transform_1(%arg0: i32) -> (i32, i32) {
    %c0_i32 = arith.constant 0 : i32
    %c0_i32_0 = arith.constant 0 : i32
    %c0_i32_1 = arith.constant 0 : i32
    return %c0_i32, %c0_i32_0 : i32, i32
  }
  func.func @transform_2(%arg0: i32) -> (i32, i32) {
    %c0_i32 = arith.constant 0 : i32
    %c0_i32_0 = arith.constant 0 : i32
    return %arg0, %c0_i32 : i32, i32
  }
}

</mosaic_0001>

<bundles_post_ra>
// kernel: tpu_custom_call.1
= control target key start
LH: loop header
LB: loop body
LE: loop exit
PB: predicated region body
PF: predicated region fallthrough
CT: control target
= control target key end

     0   :  { %7 = vsyncpa [#allocation3], 0  ;;  %s319_s0 = inlined_call_operand.hbm [shape: f32[8,256], index: 0, kind: input, shape index: {}]   ;;  %s320_s1 = inlined_call_operand.hbm [shape: f32[5,256], index: 1, kind: input, shape index: {}]   ;;  %s321_s2 = inlined_call_operand.hbm [shape: f32[8,256], index: 2, kind: output, shape index: {}]  }
   0x1   :  { %8 = vsyncpa [#allocation6], 0 }
   0x2   :  { %9 = vsyncpa [#allocation4], 0  ;;  %s249_s9 = smov [#allocation2]   ;;  %s250_s11 = smov [#allocation5]  }
   0x3   :  { %s16_s10 = sshll.u32 %s249_s9, 4  ;;  %s26_s12 = sshll.u32 %s250_s11, 4  ;;  %s17_s10 = int_to_ptr.vmem [resolvable:$true] %s16_s10  ;;  %s27_s12 = int_to_ptr.vmem [resolvable:$true] %s26_s12 }
   0x4   :  { %s177_s15 = scalar_lea.hbm %s319_s0, 256 }
   0x5   :  { %p178_p0 = scmp.ne.s32.totalorder %s319_s0, %s177_s15  ;;  %p181_p1 = scmp.lt.u32.totalorder %s177_s15, %s319_s0 }
   0x7   :  { %p183_p2 = pnand %p181_p1, %p178_p0 }
   0x9   :  { %186 = shalt.err (!%p183_p2)
}
   0xa   :  { %s187_s20 = scalar_lea.vmem %s17_s10, 256  ;;  %p192_p4 = scmp.lt.s32.totalorder %s17_s10, %s17_s10 }
   0xb   :  { %p188_p3 = scmp.ne.s32.totalorder %s17_s10, %s187_s20  ;;  %p193_p5 = scmp.lt.s32.totalorder %s187_s20, %s187_s20 }
   0xd   :  { %p194_p6 = por %p193_p5, %p192_p4 }
   0xf   :  { %p195_p7 = pnand %p194_p6, %p188_p3 }
  0x11   :  { %198 = shalt.err (!%p195_p7)
}
  0x12   :  { %19 = dma.hbm_to_vmem [thread:$0]  %s319_s0, 256, %s17_s10, [#allocation3]  }
  0x13   :  { %s199_s25 = scalar_lea.hbm %s320_s1, 256 }
  0x14   :  { %p200_p8 = scmp.ne.s32.totalorder %s320_s1, %s199_s25  ;;  %p203_p9 = scmp.lt.u32.totalorder %s199_s25, %s320_s1 }
  0x16   :  { %p205_p10 = pnand %p203_p9, %p200_p8 }
  0x18   :  { %208 = shalt.err (!%p205_p10)
}
  0x19   :  { %s209_s30 = scalar_lea.vmem %s27_s12, 256  ;;  %p214_p12 = scmp.lt.s32.totalorder %s27_s12, %s27_s12 }
  0x1a   :  { %p210_p11 = scmp.ne.s32.totalorder %s27_s12, %s209_s30  ;;  %p215_p13 = scmp.lt.s32.totalorder %s209_s30, %s209_s30 }
  0x1c   :  { %p216_p0 = por %p215_p13, %p214_p12 }
  0x1e   :  { %p217_p1 = pnand %p216_p0, %p210_p11 }
  0x20   :  { %220 = shalt.err (!%p217_p1)
}
  0x21   :  { %29 = dma.hbm_to_vmem [thread:$0]  %s320_s1, 256, %s27_s12, [#allocation6]  }
  0x22   :  { %243 = dma.done.wait [#allocation3], 256  }
  0x23   :  { %244 = vsyncadd [#allocation3], 4294967040 }
  0x24   :  { %245 = dma.done.wait [#allocation6], 256  }
  0x25   :  { %246 = vsyncadd [#allocation6], 4294967040  ;;  %v295_v0 = vld [vmem:[#allocation2] sm:$0xff]  ;;  %s251_s4 = smov 127   ;;  %s252_s5 = smov 1   ;;  %v299_v1 = vld [vmem:[#allocation2 + $0x8] sm:$0xff]  ;;  %v42_v2 = vlaneseq }
  0x26   :  { %63 = vrot.lane.b32.xlu1 %v295_v0, %s251_s4  ;;  %38 = vrot.lane.b32.xlu0 %v295_v0, %s252_s5  ;;  %v47_v7 = vld [vmem:[#allocation5] ss:$8 sm:$0x3]  ;;  %v71_v10 = vld [vmem:[#allocation5 + $0x1] ss:$8 sm:$0x3] }
  0x27   :  { %v50_v3 = vshrl.u32 %v42_v2, 7  ;;  %v43_v4 = vand.u32 127, %v42_v2  ;;  %s253_s1 = smov 16   ;;  %s254_s6 = smov 112  }
  0x28   :  { %v95_v29 = vld [vmem:[#allocation5 + $0x2] ss:$8 sm:$0x3]  ;;  %v119_v32 = vld [vmem:[#allocation5 + $0x3] ss:$8 sm:$0x3] }
  0x29   :  { %v51_v5 = vsub.s32 0, %v50_v3  ;;  %v55_v6 = vsub.s32 1, %v50_v3  ;;  %vm67_vm0 = vcmp.lt.s32.totalorder %v43_v4, 127  ;;  %vm44_vm1 = vcmp.lt.s32.totalorder %v43_v4, 1  ;;  %s255_s7 = smov [#allocation7]  }
  0x2a   :  { %65 = vrot.lane.b32.xlu1 %v299_v1, %s251_s4  ;;  %40 = vrot.lane.b32.xlu0 %v299_v1, %s252_s5  ;;  %vm91_vm2 = vcmp.lt.s32.totalorder %v43_v4, 16  ;;  %vm115_vm3 = vcmp.lt.s32.totalorder %v43_v4, 112  ;;  %v136_v41 = vld [vmem:[#allocation5 + $0x4] ss:$8 sm:$0x3]  ;;  %s160_s8 = sshll.u32 %s255_s7, 4  ;;  %s161_s8 = int_to_ptr.vmem [resolvable:$true] %s160_s8 }
  0x2b   :  { %v52_v11 = vrot.slane %v47_v7, %v51_v5  ;;  %v56_v12 = vrot.slane %v47_v7, %v55_v6  ;;  %v76_v13 = vrot.slane %v71_v10, %v51_v5  ;;  %v80_v14 = vrot.slane %v71_v10, %v55_v6  ;;  %s221_s9 = scalar_lea.vmem %s161_s8, 256  ;;  %p226_p3 = scmp.lt.s32.totalorder %s161_s8, %s161_s8 }
  0x2c   :  { %v100_v30 = vrot.slane %v95_v29, %v51_v5  ;;  %v104_v31 = vrot.slane %v95_v29, %v55_v6  ;;  %v124_v39 = vrot.slane %v119_v32, %v51_v5  ;;  %v128_v40 = vrot.slane %v119_v32, %v55_v6  ;;  %p222_p2 = scmp.ne.s32.totalorder %s161_s8, %s221_s9  ;;  %p227_p4 = scmp.lt.s32.totalorder %s221_s9, %s221_s9 }
  0x2d   :  { %v141_v44 = vrot.slane %v136_v41, %v51_v5  ;;  %v145_v45 = vrot.slane %v136_v41, %v55_v6 }
  0x2e   :  { %p228_p5 = por %p227_p4, %p226_p3 }
  0x30   :  { %p229_p6 = pnand %p228_p5, %p222_p2 }
  0x98   :  { %v64_v8 = vpop.permute.xlu1 %63  ;;  %v39_v9 = vpop.permute.xlu0 %38 }
  0x9c   :  { %v66_v15 = vpop.permute.xlu1 %65  ;;  %v41_v16 = vpop.permute.xlu0 %40 }
  0x9d   :  { %v68_v17 = vsel %vm67_vm0, %v64_v8, %v66_v15  ;;  %v69_v18 = vsel %vm67_vm0, %v66_v15, %v64_v8  ;;  %v45_v19 = vsel %vm44_vm1, %v39_v9, %v41_v16  ;;  %v46_v20 = vsel %vm44_vm1, %v41_v16, %v39_v9 }
  0x9e   :  { %v59_v21 = vmul.f32 %v52_v11, %v46_v20  ;;  %v60_v22 = vmul.f32 %v56_v12, %v45_v19  ;;  %v83_v23 = vmul.f32 %v76_v13, %v68_v17  ;;  %v84_v24 = vmul.f32 %v80_v14, %v69_v18 }
  0xa0   :  { %v61_v25 = vadd.f32 %v59_v21, %v295_v0  ;;  %v62_v26 = vadd.f32 %v60_v22, %v299_v1 }
  0xa2   :  { %v85_v27 = vadd.f32 %v83_v23, %v61_v25  ;;  %v86_v28 = vadd.f32 %v84_v24, %v62_v26 }
  0xa4   :  { %87 = vrot.lane.b32.xlu0 %v85_v27, %s253_s1  ;;  %89 = vrot.lane.b32.xlu1 %v86_v28, %s253_s1 }
  0xa8   :  { %111 = vrot.lane.b32.xlu0 %v85_v27, %s254_s6  ;;  %113 = vrot.lane.b32.xlu1 %v86_v28, %s254_s6 }
 0x116   :  { %v88_v33 = vpop.permute.xlu0 %87  ;;  %v90_v34 = vpop.permute.xlu1 %89 }
 0x117   :  { %v92_v35 = vsel %vm91_vm2, %v88_v33, %v90_v34  ;;  %v93_v36 = vsel %vm91_vm2, %v90_v34, %v88_v33 }
 0x118   :  { %v107_v37 = vmul.f32 %v100_v30, %v93_v36  ;;  %v108_v38 = vmul.f32 %v104_v31, %v92_v35 }
 0x11a   :  { %v112_v42 = vpop.permute.xlu0 %111  ;;  %v114_v43 = vpop.permute.xlu1 %113  ;;  %v109_v48 = vadd.f32 %v107_v37, %v85_v27  ;;  %v110_v49 = vadd.f32 %v108_v38, %v86_v28 }
 0x11b   :  { %v116_v46 = vsel %vm115_vm3, %v112_v42, %v114_v43  ;;  %v117_v47 = vsel %vm115_vm3, %v114_v43, %v112_v42 }
 0x11c   :  { %v131_v50 = vmul.f32 %v124_v39, %v116_v46  ;;  %v132_v51 = vmul.f32 %v128_v40, %v117_v47 }
 0x11e   :  { %v133_v52 = vadd.f32 %v131_v50, %v109_v48  ;;  %v134_v53 = vadd.f32 %v132_v51, %v110_v49 }
 0x120   :  { %v148_v54 = vmul.f32 %v141_v44, %v133_v52  ;;  %v149_v55 = vmul.f32 %v145_v45, %v134_v53 }
 0x122   :  { %v150_v56 = vsub.f32 %v148_v54, %v295_v0  ;;  %v151_v57 = vsub.f32 %v149_v55, %v299_v1 }
 0x124   :  { %152 = vst [vmem:[#allocation7] sm:$0xff] %v150_v56  ;;  %153 = vst [vmem:[#allocation7 + $0x8] sm:$0xff] %v151_v57 }
 0x125   :  { %232 = shalt.err (!%p229_p6)
}
 0x126   :  { %s233_s12 = scalar_lea.hbm %s321_s2, 256 }
 0x127   :  { %p234_p7 = scmp.ne.s32.totalorder %s321_s2, %s233_s12  ;;  %p237_p8 = scmp.lt.u32.totalorder %s233_s12, %s321_s2 }
 0x129   :  { %p239_p9 = pnand %p237_p8, %p234_p7 }
 0x12b   :  { %242 = shalt.err (!%p239_p9)
}
 0x12c   :  { %163 = dma.vmem_to_hbm [thread:$0]  %s161_s8, 256, %s321_s2, [#allocation4]  }
 0x12d   :  { %247 = dma.done.wait [#allocation4], 256  }
 0x12e   :  { %248 = vsyncadd [#allocation4], 4294967040 }
 0x12f   :  { %167 = vsyncpa [#allocation3], 1 }
 0x130   :  { %168 = vsyncpa [#allocation6], 1 }
 0x131   :  { %169 = vsyncpa [#allocation4], 1 }

</bundles_post_ra>
